<compile_context>
chip_gen: v6e
topology: v6e:2x2x1
jax: 0.10.0
libtpu: 0.0.40
codegen_flags: <defaults>
</compile_context>

<pallas_src>
import functools

import jax
import jax.numpy as jnp
from jax.experimental import pallas as pl
from jax.experimental.pallas import tpu as pltpu

_LANES = 128
_DEFAULT_BLOCK_ROWS = 1024  # (1024, 128) f32 block = 512 KiB; 2 in x 2 buf = 2 MiB VMEM


def _mse_sums_kernel(pred_ref, tgt_ref, sse_ref, npos_ref, *,
                     thresh, n_valid, block_rows, count_pos):
    """Per-slice accumulation of sum((pred-target)^2) and sum(target > thresh).

    sse_ref / npos_ref are (8, 128) f32 per-lane partial sums, resident in VMEM
    across the inner ("arbitrary") grid axis.
    """
    c = pl.program_id(0)          # slice (parallel axis, 2 on v7x megacore)
    i = pl.program_id(1)          # streaming step within the slice
    steps = pl.num_programs(1)

    @pl.when(i == 0)
    def _init():
        sse_ref[...] = jnp.zeros_like(sse_ref)
        npos_ref[...] = jnp.zeros_like(npos_ref)

    p = pred_ref[...].astype(jnp.float32)
    t = tgt_ref[...].astype(jnp.float32)

    # Global element index of every lane in this (possibly partial / clamped
    # duplicate) block: masks wrapper padding, ragged tail rows and the
    # re-read tail blocks produced by the clamped index_map.
    row0 = (c * steps + i) * block_rows
    rows = jax.lax.broadcasted_iota(jnp.int32, p.shape, 0) + row0
    lanes = jax.lax.broadcasted_iota(jnp.int32, p.shape, 1)
    valid = rows * _LANES + lanes < n_valid

    d = jnp.where(valid, p - t, 0.0)
    # Fold the (block_rows, 128) tile onto the (8, 128) accumulator with pure
    # element-wise vreg adds (no cross-lane XLU reduce inside the hot loop).
    sse_ref[...] += (d * d).reshape(-1, 8, _LANES).sum(axis=0)

    if count_pos:
        pos = jnp.where(valid & (t > jnp.float32(thresh)), 1.0, 0.0)
        npos_ref[...] += pos.reshape(-1, 8, _LANES).sum(axis=0)


def _mse_sums(pred, target, thresh=0.0, count_pos=True):
    """Pallas streaming reduction. Returns (sum_sq_err, n_pos) f32 scalars."""
    assert pred.shape == target.shape
    n = pred.size

    flat_p = pred.reshape(-1)
    flat_t = target.reshape(-1)

    # Whole 128-lane rows, at least 8 rows. For the common case
    # (n % 128 == 0 and n >= 1024) this is a free reshape with NO padding copy;
    # otherwise we pad a small tail, which is masked out in-kernel anyway.
    n_rows = max(8, pl.cdiv(n, _LANES))
    padded = n_rows * _LANES
    if padded != n:
        flat_p = jnp.pad(flat_p, (0, padded - n))
        flat_t = jnp.pad(flat_t, (0, padded - n))
    p2 = flat_p.reshape(n_rows, _LANES)
    t2 = flat_t.reshape(n_rows, _LANES)

    block_rows = min(_DEFAULT_BLOCK_ROWS, (n_rows // 8) * 8)   # multiple of 8
    steps_total = pl.cdiv(n_rows, block_rows)
    num_slices = 2 if steps_total >= 2 else 1                  # v7x: one per TC
    steps_per_slice = pl.cdiv(steps_total, num_slices)
    last_block = steps_total - 1

    def in_map(c, i):
        # Clamp so every DMA stays inside the array; duplicated tail steps are
        # fully masked in the kernel via the global element index.
        return (jnp.minimum(c * steps_per_slice + i, last_block), 0)

    kernel = functools.partial(
        _mse_sums_kernel,
        thresh=float(thresh),
        n_valid=n,
        block_rows=block_rows,
        count_pos=count_pos,
    )

    sse_part, npos_part = pl.pallas_call(
        kernel,
        out_shape=(
            jax.ShapeDtypeStruct((num_slices * 8, _LANES), jnp.float32),
            jax.ShapeDtypeStruct((num_slices * 8, _LANES), jnp.float32),
        ),
        grid_spec=pltpu.PrefetchScalarGridSpec(
            num_scalar_prefetch=0,
            grid=(num_slices, steps_per_slice),
            in_specs=[
                pl.BlockSpec((block_rows, _LANES), in_map),
                pl.BlockSpec((block_rows, _LANES), in_map),
            ],
            out_specs=(
                pl.BlockSpec((8, _LANES), lambda c, i: (c, 0)),
                pl.BlockSpec((8, _LANES), lambda c, i: (c, 0)),
            ),
        ),
        compiler_params=pltpu.CompilerParams(
            dimension_semantics=("parallel", "arbitrary")),
    )(p2, t2)

    # Tiny final cross-lane / cross-slice reduction done by XLA on (<=16,128).
    return jnp.sum(sse_part), jnp.sum(npos_part)


def mse_loss(pred, target, rebalance=False, thresh=0.0):
    """JAX/Pallas equivalent of MSELoss(rebalance).forward(pred, target, mask=None)."""
    n = pred.size
    sse, npos = _mse_sums(pred, target, thresh=thresh, count_pos=rebalance)
    mse = sse / jnp.float32(n)  # nn.MSELoss default reduction='mean'

    if not rebalance:
        # cost = loss.sum() of a scalar == the scalar itself.
        return mse

    # gunpowder_balance with mask=None (scalar glue; the heavy reductions were
    # already done in the kernel above).
    nmsk = jnp.float32(n)
    nneg = nmsk - npos                      # sum(target <= thresh)
    fpos = jnp.clip(npos / nmsk, 0.05, 0.95)
    fneg = 1.0 - fpos
    wpos = 1.0 / (2.0 * fpos)
    wneg = 1.0 / (2.0 * fneg)
    weight_sum = npos * wpos + nneg * wneg  # sum of the rebalance weight tensor
    # cost = (mse_scalar * weight).sum() = mse_scalar * weight_sum
    return mse * weight_sum


def _reference(pred, target, rebalance=False, thresh=0.0):
    """Plain-JAX reference mirroring the PyTorch module (mask=None)."""
    mse = jnp.mean((pred.astype(jnp.float32) - target.astype(jnp.float32)) ** 2)
    if not rebalance:
        return mse
    n = pred.size
    lpos = (target > thresh).astype(jnp.float32)
    lneg = (target <= thresh).astype(jnp.float32)
    npos = lpos.sum()
    fpos = jnp.clip(npos / n, 0.05, 0.95)
    fneg = 1.0 - fpos
    weight = lpos / (2.0 * fpos) + lneg / (2.0 * fneg)
    return (mse * weight).sum()


if __name__ == "__main__":
    key = jax.random.PRNGKey(0)

    # Primary small NCHW case: batch=2, channels=4, spatial=16x16.
    kp, kt = jax.random.split(key)
    pred = jax.random.normal(kp, (2, 4, 16, 16), dtype=jnp.float32)
    target = jax.random.normal(kt, (2, 4, 16, 16), dtype=jnp.float32)

    out_plain = jax.block_until_ready(mse_loss(pred, target, rebalance=False))
    out_rebal = jax.block_until_ready(mse_loss(pred, target, rebalance=True))
    ref_plain = _reference(pred, target, rebalance=False)
    ref_rebal = _reference(pred, target, rebalance=True)
    assert jnp.allclose(out_plain, ref_plain, rtol=1e-5, atol=1e-5), (out_plain, ref_plain)
    assert jnp.allclose(out_rebal, ref_rebal, rtol=1e-5, atol=1e-5), (out_rebal, ref_rebal)

    # Ragged size + negative threshold: exercises in-kernel tail masking
    # (padded zeros must NOT count towards npos).
    kp2, kt2 = jax.random.split(jax.random.fold_in(key, 1))
    pred2 = jax.random.normal(kp2, (2, 3, 9, 13), dtype=jnp.float32)
    target2 = jax.random.normal(kt2, (2, 3, 9, 13), dtype=jnp.float32)
    out2 = jax.block_until_ready(mse_loss(pred2, target2, rebalance=True, thresh=-0.1))
    ref2 = _reference(pred2, target2, rebalance=True, thresh=-0.1)
    assert jnp.allclose(out2, ref2, rtol=1e-4, atol=1e-5), (out2, ref2)

    # Multi-step, two-slice grid: exercises the parallel split, a partial last
    # block and the clamped duplicate tail step.
    kp3, kt3 = jax.random.split(jax.random.fold_in(key, 2))
    pred3 = jax.random.normal(kp3, (2, 4, 160, 256), dtype=jnp.float32)
    target3 = jax.random.normal(kt3, (2, 4, 160, 256), dtype=jnp.float32)
    out3 = jax.block_until_ready(mse_loss(pred3, target3, rebalance=True))
    ref3 = _reference(pred3, target3, rebalance=True)
    assert jnp.allclose(out3, ref3, rtol=1e-4, atol=1e-4), (out3, ref3)

    print("KERNEL_OK")
</pallas_src>

<mosaic_0001>
module attributes {stable_mosaic.version = 11 : i64} {
  func.func @_mse_sums_kernel(%arg0: i32, %arg1: i32, %arg2: memref<16x128xf32, #tpu.memory_space<vmem>>, %arg3: memref<16x128xf32, #tpu.memory_space<vmem>>, %arg4: memref<8x128xf32, #tpu.memory_space<vmem>>, %arg5: memref<8x128xf32, #tpu.memory_space<vmem>>) attributes {dimension_semantics = [#tpu.dimension_semantics<parallel>, #tpu.dimension_semantics<arbitrary>], iteration_bounds = array<i64: 1, 1>, scalar_prefetch = 0 : i64, scratch_operands = 0 : i64, tpu.core_type = #tpu.core_type<tc>, window_params = [{transform_indices = @transform_0, window_bounds = array<i64: 16, 128>}, {transform_indices = @transform_1, window_bounds = array<i64: 16, 128>}, {transform_indices = @transform_2, window_bounds = array<i64: 8, 128>}, {transform_indices = @transform_3, window_bounds = array<i64: 8, 128>}]} {
    %c0_i32 = arith.constant 0 : i32
    %0 = arith.cmpi eq, %arg1, %c0_i32 : i32
    %1 = arith.extui %0 : i1 to i32
    %c0_i32_0 = arith.constant 0 : i32
    %2 = arith.cmpi ne, %1, %c0_i32_0 : i32
    scf.if %2 {
      %cst_9 = arith.constant 0.000000e+00 : f32
      %26 = vector.broadcast %cst_9 : f32 to vector<8x128xf32>
      %c0_10 = arith.constant 0 : index
      %c0_11 = arith.constant 0 : index
      %27 = vector.load %arg4[%c0_10, %c0_11] : memref<8x128xf32, #tpu.memory_space<vmem>>, vector<8x128xf32>
      tpu.vector_store %arg4[%c0_10, %c0_11], %26 {strides = array<i32>} : memref<8x128xf32, #tpu.memory_space<vmem>>, vector<8x128xf32>,
      %cst_12 = arith.constant 0.000000e+00 : f32
      %28 = vector.broadcast %cst_12 : f32 to vector<8x128xf32>
      %c0_13 = arith.constant 0 : index
      %c0_14 = arith.constant 0 : index
      %29 = vector.load %arg5[%c0_13, %c0_14] : memref<8x128xf32, #tpu.memory_space<vmem>>, vector<8x128xf32>
      tpu.vector_store %arg5[%c0_13, %c0_14], %28 {strides = array<i32>} : memref<8x128xf32, #tpu.memory_space<vmem>>, vector<8x128xf32>,
    } else {
    }
    %c0 = arith.constant 0 : index
    %c0_1 = arith.constant 0 : index
    %3 = vector.load %arg2[%c0, %c0_1] : memref<16x128xf32, #tpu.memory_space<vmem>>, vector<16x128xf32>
    %c0_2 = arith.constant 0 : index
    %c0_3 = arith.constant 0 : index
    %4 = vector.load %arg3[%c0_2, %c0_3] : memref<16x128xf32, #tpu.memory_space<vmem>>, vector<16x128xf32>
    %c1_i32 = arith.constant 1 : i32
    %5 = arith.muli %arg0, %c1_i32 : i32
    %6 = arith.addi %5, %arg1 : i32
    %c16_i32 = arith.constant 16 : i32
    %7 = arith.muli %6, %c16_i32 : i32
    %8 = tpu.iota {dimensions = array<i32: 0>} : vector<16x128xi32>
    %9 = vector.broadcast %7 : i32 to vector<16x128xi32>
    %10 = arith.addi %8, %9 : vector<16x128xi32>
    %11 = tpu.iota {dimensions = array<i32: 1>} : vector<16x128xi32>
    %c128_i32 = arith.constant 128 : i32
    %12 = vector.broadcast %c128_i32 : i32 to vector<16x128xi32>
    %13 = arith.muli %10, %12 : vector<16x128xi32>
    %14 = arith.addi %13, %11 : vector<16x128xi32>
    %c2048_i32 = arith.constant 2048 : i32
    %15 = vector.broadcast %c2048_i32 : i32 to vector<16x128xi32>
    %16 = arith.cmpi slt, %14, %15 : vector<16x128xi32>
    %17 = arith.subf %3, %4 : vector<16x128xf32>
    %cst = arith.constant 0.000000e+00 : f32
    %18 = vector.broadcast %cst : f32 to vector<16x128xf32>
    %19 = arith.select %16, %17, %18 : vector<16x128xi1>, vector<16x128xf32>
    %c0_4 = arith.constant 0 : index
    %c0_5 = arith.constant 0 : index
    %20 = vector.load %arg4[%c0_4, %c0_5] : memref<8x128xf32, #tpu.memory_space<vmem>>, vector<8x128xf32>
    %21 = arith.mulf %19, %19 : vector<16x128xf32>
    %22 = vector.shape_cast %21 : vector<16x128xf32> to vector<2x8x128xf32>
    %cst_6 = arith.constant dense<0.000000e+00> : vector<8x128xf32>
    %23 = vector.multi_reduction <add>, %22, %cst_6 [0] : vector<2x8x128xf32> to vector<8x128xf32>
    %24 = arith.addf %20, %23 : vector<8x128xf32>
    %c0_7 = arith.constant 0 : index
    %c0_8 = arith.constant 0 : index
    %25 = vector.load %arg4[%c0_7, %c0_8] : memref<8x128xf32, #tpu.memory_space<vmem>>, vector<8x128xf32>
    tpu.vector_store %arg4[%c0_7, %c0_8], %24 {strides = array<i32>} : memref<8x128xf32, #tpu.memory_space<vmem>>, vector<8x128xf32>,
    return
  }
  func.func @transform_0(%arg0: i32, %arg1: i32) -> (i32, i32) {
    %c1_i32 = arith.constant 1 : i32
    %0 = arith.muli %arg0, %c1_i32 : i32
    %1 = arith.addi %0, %arg1 : i32
    %c0_i32 = arith.constant 0 : i32
    %2 = arith.minsi %1, %c0_i32 : i32
    %c0_i32_0 = arith.constant 0 : i32
    %c0_i32_1 = arith.constant 0 : i32
    return %2, %c0_i32_0 : i32, i32
  }
  func.func @transform_1(%arg0: i32, %arg1: i32) -> (i32, i32) {
    %c1_i32 = arith.constant 1 : i32
    %0 = arith.muli %arg0, %c1_i32 : i32
    %1 = arith.addi %0, %arg1 : i32
    %c0_i32 = arith.constant 0 : i32
    %2 = arith.minsi %1, %c0_i32 : i32
    %c0_i32_0 = arith.constant 0 : i32
    %c0_i32_1 = arith.constant 0 : i32
    return %2, %c0_i32_0 : i32, i32
  }
  func.func @transform_2(%arg0: i32, %arg1: i32) -> (i32, i32) {
    %c0_i32 = arith.constant 0 : i32
    %c0_i32_0 = arith.constant 0 : i32
    return %arg0, %c0_i32 : i32, i32
  }
  func.func @transform_3(%arg0: i32, %arg1: i32) -> (i32, i32) {
    %c0_i32 = arith.constant 0 : i32
    %c0_i32_0 = arith.constant 0 : i32
    return %arg0, %c0_i32 : i32, i32
  }
}

</mosaic_0001>

<bundles_post_ra>
// kernel: tpu_custom_call.1
= control target key start
LH: loop header
LB: loop body
LE: loop exit
PB: predicated region body
PF: predicated region fallthrough
CT: control target
= control target key end

     0   :  { %9 = vsyncpa [#allocation3], 0  ;;  %s267_s0 = inlined_call_operand.hbm [shape: f32[16,128], index: 0, kind: input, shape index: {}]   ;;  %s268_s1 = inlined_call_operand.hbm [shape: f32[16,128], index: 1, kind: input, shape index: {}]   ;;  %s269_s2 = inlined_call_operand.hbm [shape: f32[8,128], index: 2, kind: output, shape index: {0}]   ;;  %s270_s3 = inlined_call_operand.hbm [shape: f32[8,128], index: 3, kind: output, shape index: {1}]  }
   0x1   :  { %10 = vsyncpa [#allocation6], 0 }
   0x2   :  { %11 = vsyncpa [#allocation4], 0 }
   0x3   :  { %12 = vsyncpa [#allocation9], 0  ;;  %s228_s12 = smov [#allocation2]  }
   0x4   :  { %s24_s13 = sshll.u32 %s228_s12, 4  ;;  %s25_s13 = int_to_ptr.vmem [resolvable:$true] %s24_s13 }
   0x5   :  { %s148_s14 = scalar_lea.vmem %s25_s13, 256  ;;  %p153_p1 = scmp.lt.s32.totalorder %s25_s13, %s25_s13 }
   0x6   :  { %p149_p0 = scmp.ne.s32.totalorder %s25_s13, %s148_s14  ;;  %p154_p2 = scmp.lt.s32.totalorder %s148_s14, %s148_s14 }
   0x8   :  { %p155_p3 = por %p154_p2, %p153_p1 }
   0xa   :  { %p156_p4 = pnand %p155_p3, %p149_p0 }
   0xc   :  { %159 = shalt.err (!%p156_p4)
}
   0xd   :  { %s229_s15 = smov 128   ;;  %s230_s16 = smov 8  }
   0xe   :  { %30 = dma.hbm_to_vmem [thread:$0]  %s267_s0, 256, %s25_s13, [#allocation3], %s229_s15, %s229_s15, %s230_s16  }
   0xf   :  { %s231_s19 = smov [#allocation5]  }
  0x10   :  { %s42_s20 = sshll.u32 %s231_s19, 4  ;;  %s43_s20 = int_to_ptr.vmem [resolvable:$true] %s42_s20 }
  0x11   :  { %s168_s21 = scalar_lea.vmem %s43_s20, 256  ;;  %p173_p6 = scmp.lt.s32.totalorder %s43_s20, %s43_s20 }
  0x12   :  { %p169_p5 = scmp.ne.s32.totalorder %s43_s20, %s168_s21  ;;  %p174_p7 = scmp.lt.s32.totalorder %s168_s21, %s168_s21 }
  0x14   :  { %p175_p8 = por %p174_p7, %p173_p6 }
  0x16   :  { %p176_p9 = pnand %p175_p8, %p169_p5 }
  0x18   :  { %179 = shalt.err (!%p176_p9)
}
  0x19   :  { %48 = dma.hbm_to_vmem [thread:$0]  %s268_s1, 256, %s43_s20, [#allocation6], %s229_s15, %s229_s15, %s230_s16  }
  0x1a   :  { %220 = dma.done.wait [#allocation3], 256  }
  0x1b   :  { %221 = vsyncadd [#allocation3], 4294967040 }
  0x1c   :  { %222 = dma.done.wait [#allocation6], 256  }
  0x1d   :  { %223 = vsyncadd [#allocation6], 4294967040  ;;  %v75_v0 = vlaneseq  ;;  %v232_v1 = vmov 0.0   ;;  %s233_s0 = smov [#allocation8]  }
  0x1e   :  { %68 = vst [vmem:[#allocation8] sm:$0xff] %v232_v1  ;;  %s115_s24 = sshll.u32 %s233_s0, 4  ;;  %s116_s24 = int_to_ptr.vmem [resolvable:$true] %s115_s24 }
  0x1f   :  { %v76_v2 = vshrl.u32 %v75_v0, 7  ;;  %v82_v3 = vand.u32 127, %v75_v0  ;;  %s180_s25 = scalar_lea.vmem %s116_s24, 128  ;;  %p185_p11 = scmp.lt.s32.totalorder %s116_s24, %s116_s24 }
  0x20   :  { %p181_p10 = scmp.ne.s32.totalorder %s116_s24, %s180_s25  ;;  %p186_p12 = scmp.lt.s32.totalorder %s180_s25, %s180_s25 }
  0x22   :  { %p187_p13 = por %p186_p12, %p185_p11 }
  0x24   :  { %p188_p0 = pnand %p187_p13, %p181_p10 }
  0x26   :  { %191 = shalt.err (!%p188_p0)
}
  0x27   :  { %118 = dma.vmem_to_hbm [thread:$0]  %s116_s24, 128, %s270_s3, [#allocation9]   ;;  %v77_v4 = vadd.s32 8, %v76_v2  ;;  %v83_v5 = vmul.u32 128, %v76_v2  ;;  %v69_v8 = vld [vmem:[#allocation2] sm:$0xff]  ;;  %v70_v9 = vld [vmem:[#allocation2 + $0x8] sm:$0xff] }
  0x28   :  { %v71_v10 = vld [vmem:[#allocation5] sm:$0xff]  ;;  %v72_v11 = vld [vmem:[#allocation5 + $0x8] sm:$0xff]  ;;  %s234_s27 = smov [#allocation7]  }
  0x29   :  { %v84_v6 = vmul.u32 128, %v77_v4  ;;  %v85_v7 = vadd.s32 %v83_v5, %v82_v3  ;;  %v89_v13 = vsub.f32 %v69_v8, %v71_v10  ;;  %v90_v14 = vsub.f32 %v70_v9, %v72_v11  ;;  %s105_s28 = sshll.u32 %s234_s27, 4  ;;  %s106_s28 = int_to_ptr.vmem [resolvable:$true] %s105_s28 }
  0x2a   :  { %s200_s3 = scalar_lea.vmem %s106_s28, 128  ;;  %p205_p2 = scmp.lt.s32.totalorder %s106_s28, %s106_s28 }
  0x2b   :  { %v86_v12 = vadd.s32 %v84_v6, %v82_v3  ;;  %vm87_vm0 = vcmp.lt.s32.totalorder %v85_v7, 2048  ;;  %p201_p1 = scmp.ne.s32.totalorder %s106_s28, %s200_s3  ;;  %p206_p3 = scmp.lt.s32.totalorder %s200_s3, %s200_s3 }
  0x2c   :  { %v91_v15 = vsel %vm87_vm0, %v89_v13, 0.0 }
  0x2d   :  { %vm88_vm1 = vcmp.lt.s32.totalorder %v86_v12, 2048  ;;  %v94_v17 = vmul.f32 %v91_v15, %v91_v15  ;;  %p207_p4 = por %p206_p3, %p205_p2 }
  0x2e   :  { %v92_v16 = vsel %vm88_vm1, %v90_v14, 0.0 }
  0x2f   :  { %v95_v18 = vmul.f32 %v92_v16, %v92_v16  ;;  %p208_p5 = pnand %p207_p4, %p201_p1 }
  0x31   :  { %v96_v19 = vadd.f32 %v95_v18, %v94_v17 }
  0x33   :  { %98 = vst [vmem:[#allocation7] sm:$0xff] %v96_v19 }
  0x34   :  { %211 = shalt.err (!%p208_p5)
}
  0x35   :  { %108 = dma.vmem_to_hbm [thread:$0]  %s106_s28, 128, %s269_s2, [#allocation4]  }
  0x36   :  { %224 = dma.done.wait [#allocation4], 128  }
  0x37   :  { %225 = vsyncadd [#allocation4], 4294967168 }
  0x38   :  { %226 = dma.done.wait [#allocation9], 128  }
  0x39   :  { %227 = vsyncadd [#allocation9], 4294967168 }
  0x3a   :  { %125 = vsyncpa [#allocation3], 1 }
  0x3b   :  { %126 = vsyncpa [#allocation6], 1 }
  0x3c   :  { %127 = vsyncpa [#allocation4], 1 }
  0x3d   :  { %128 = vsyncpa [#allocation9], 1 }

</bundles_post_ra>
